<compile_context>
chip_gen: v7x
topology: tpu7x:2x2x1
jax: 0.10.0
libtpu: 0.0.40
codegen_flags: <defaults>
</compile_context>

<pallas_src>
import jax
import jax.numpy as jnp
from jax import lax
from jax.experimental import pallas as pl
from jax.experimental.pallas import tpu as pltpu  # noqa: F401  (TPU backend)


# ----------------------------- Pallas kernel -------------------------------

def _bilstm_fused_kernel(x_ref, h0_ref, c0_ref, wih_ref, whh_ref, b_ref,
                         out_ref, hc_ref):
    """Fused bidirectional LSTM recurrence, both directions advanced in lockstep.

    x_ref  : (T*2B, 2E) bf16, block-diagonally packed: for step s,
             rows [s*2B, s*2B+B)   = [x_fwd[s] | 0]
             rows [s*2B+B, s*2B+2B)= [0 | x_bwd[s]]  with x_bwd[s] = x[T-1-s]
    h0_ref : (2B, H) f32   rows 0..B-1 forward init, B..2B-1 backward init
    c0_ref : (2B, H) f32
    wih_ref: (2E, 4H) bf16 = [W_ih_fwd ; W_ih_bwd] stacked on the input axis
    whh_ref: (2H, 4H) bf16 = [W_hh_fwd ; W_hh_bwd]
    b_ref  : (2B, 4H) f32  per-row combined bias (b_ih + b_hh) for each dir
    out_ref: (B, 2H) f32   cat(h_fwd_final, h_bwd_final) along lanes
    hc_ref : (2B, 2H) f32  [h_final | c_final] along lanes
    """
    TB2, _ = x_ref.shape
    B2, H = h0_ref.shape            # B2 = 2B
    B = B2 // 2
    T = TB2 // B2
    H4 = 4 * H

    # ---- Hoisted input projection: one MXU op covering every timestep of
    # both directions; bias folded in once (outside the serial chain).
    xw = jnp.dot(x_ref[...], wih_ref[...],
                 preferred_element_type=jnp.float32)        # (T*2B, 4H) f32
    gates_x = xw.reshape(T, B2, H4) + b_ref[...][None]      # (T, 2B, 4H)

    whh = whh_ref[...]                                      # (2H, 4H) bf16

    # Static masks, computed once.
    row = lax.broadcasted_iota(jnp.int32, (B2, 2 * H), 0)
    col = lax.broadcasted_iota(jnp.int32, (B2, 2 * H), 1)
    dir_mask = ((row < B) & (col < H)) | ((row >= B) & (col >= H))
    gcol = lax.broadcasted_iota(jnp.int32, (B2, H4), 1)
    g_mask = (gcol >= 2 * H) & (gcol < 3 * H)               # lanes of the g gate

    h = h0_ref[...]                                         # (2B, H) f32
    c = c0_ref[...]                                         # (2B, H) f32

    # T is small and static: full unroll -> static slices + cross-iteration
    # scheduler visibility (MXU latency overlaps previous step's EUP work).
    for s in range(T):
        # Block-diagonal hidden layout so one matmul serves both directions:
        # fwd rows = [h | 0], bwd rows = [0 | h].
        h_pad = jnp.where(dir_mask, jnp.concatenate([h, h], axis=1), 0.0)
        hh = jnp.dot(h_pad.astype(jnp.bfloat16), whh,
                     preferred_element_type=jnp.float32)    # (2B, 4H)
        gates = gates_x[s] + hh

        # Full-width activations on the whole (2B, 4H) tile, then select the
        # tanh lanes for the g gate; slice only for the elementwise combine.
        act = jnp.where(g_mask, jnp.tanh(gates), jax.nn.sigmoid(gates))
        i = act[:, 0:H]
        f = act[:, H:2 * H]
        g = act[:, 2 * H:3 * H]
        o = act[:, 3 * H:4 * H]

        c = f * c + i * g
        h = o * jnp.tanh(c)

    # Lane-dense final stores (no JAX-side concatenate needed afterwards).
    out_ref[...] = jnp.concatenate([h[:B], h[B:]], axis=1)  # (B, 2H)
    hc_ref[...] = jnp.concatenate([h, c], axis=1)           # (2B, 2H)


def bilstm_final_state(x_packed, h0p, c0p, wih_p, whh_p, b_p, B, H):
    """Runs the fused bi-LSTM kernel. Returns (out_cat (B,2H), hc (2B,2H))."""
    return pl.pallas_call(
        _bilstm_fused_kernel,
        out_shape=(jax.ShapeDtypeStruct((B, 2 * H), jnp.float32),
                   jax.ShapeDtypeStruct((2 * B, 2 * H), jnp.float32)),
    )(x_packed, h0p, c0p, wih_p, whh_p, b_p)


# --------------------------- Module-level wrapper ---------------------------

class WordAttNetPallas:
    """JAX/Pallas re-implementation of WordAttNet.forward.

    word_weight / word_bias / context_weight are created (as in the PyTorch
    __init__) but, exactly like the reference forward(), never used.
    Dropout is implemented as identity (eval semantics).
    """

    def __init__(self, key, vocab_rows=20, embed_size=32, hidden_size=32):
        H, E = hidden_size, embed_size
        ks = jax.random.split(key, 8)

        # Embedding table: [pad_word(0s); unknown_word(0s); pretrained rows]
        pretrained = 0.1 * jax.random.normal(ks[0], (vocab_rows, E), jnp.float32)
        self.embedding = jnp.concatenate(
            [jnp.zeros((1, E), jnp.float32),
             jnp.zeros((1, E), jnp.float32),
             pretrained], axis=0)                          # (vocab_rows + 2, E)
        self.dict_len = vocab_rows + 2
        self.hidden_size = H
        self.embed_size = E

        # Unused-in-forward attention params (kept for shape fidelity).
        self.word_weight = 0.05 * jax.random.normal(ks[1], (2 * H, 2 * H))
        self.word_bias = jnp.zeros((1, 2 * H), jnp.float32)
        self.context_weight = 0.05 * jax.random.normal(ks[2], (2 * H, 1))

        # Bidirectional LSTM parameters, PyTorch gate order [i, f, g, o].
        w_ih = 0.05 * jax.random.normal(ks[3], (2, 4 * H, E), jnp.float32)
        w_hh = 0.05 * jax.random.normal(ks[4], (2, 4 * H, H), jnp.float32)
        b_ih = 0.05 * jax.random.normal(ks[5], (2, 4 * H), jnp.float32)
        b_hh = 0.05 * jax.random.normal(ks[6], (2, 4 * H), jnp.float32)

        # f32 per-direction copies (used by the pure-JAX reference check).
        self.w_ih_t = jnp.transpose(w_ih, (0, 2, 1))        # (2, E, 4H)
        self.w_hh_t = jnp.transpose(w_hh, (0, 2, 1))        # (2, H, 4H)
        self.bias = b_ih + b_hh                             # (2, 4H)

        # Packed bf16 kernel weights: directions stacked block-diagonally.
        self.wih_packed = jnp.concatenate(
            [self.w_ih_t[0], self.w_ih_t[1]], axis=0).astype(jnp.bfloat16)  # (2E, 4H)
        self.whh_packed = jnp.concatenate(
            [self.w_hh_t[0], self.w_hh_t[1]], axis=0).astype(jnp.bfloat16)  # (2H, 4H)

    def forward(self, input_ids, hidden_state):
        h0, c0 = hidden_state                               # each (2, B, H)
        T, B = input_ids.shape
        H, E = self.hidden_size, self.embed_size

        # Embedding lookup (gather) kept as JAX glue.
        emb = self.embedding[input_ids].astype(jnp.float32)  # (T, B, E)
        # TODO(synk): nn.Dropout(p=0.5) in train mode is stochastic; eval
        # semantics (identity) are used here.

        # Layout plumbing (cheap XLA ops): pack forward x[t] and backward
        # x[T-1-t] in lockstep along the batch axis, block-diagonal over E so a
        # single packed weight serves both directions.
        zeros = jnp.zeros_like(emb)
        x_fwd = jnp.concatenate([emb, zeros], axis=-1)            # (T, B, 2E)
        x_bwd = jnp.concatenate([zeros, emb[::-1]], axis=-1)      # (T, B, 2E)
        x_packed = jnp.concatenate([x_fwd, x_bwd], axis=1)        # (T, 2B, 2E)
        x_packed = x_packed.reshape(T * 2 * B, 2 * E).astype(jnp.bfloat16)

        h0p = h0.reshape(2 * B, H)
        c0p = c0.reshape(2 * B, H)
        b_p = jnp.concatenate(
            [jnp.broadcast_to(self.bias[0], (B, 4 * H)),
             jnp.broadcast_to(self.bias[1], (B, 4 * H))], axis=0)  # (2B, 4H)

        out_cat, hc = bilstm_final_state(
            x_packed, h0p, c0p, self.wih_packed, self.whh_packed, b_p, B, H)

        h_n = hc[:, :H].reshape(2, B, H)
        c_n = hc[:, H:].reshape(2, B, H)
        # cat(h[-2], h[-1], dim=1).unsqueeze(0) already done lane-dense in-kernel.
        output = out_cat[None]                              # (1, B, 2H)
        return output, (h_n, c_n)


# ------------------------------ pure-JAX ref --------------------------------

def _lstm_ref(emb, h0, c0, w_ih_t, w_hh_t, bias, H):
    """Reference bi-LSTM final states with lax.scan, for correctness check."""
    def run_dir(xs, h, c, wih, whh, b):
        def step(carry, x_t):
            h, c = carry
            g = x_t @ wih + h @ whh + b
            i = jax.nn.sigmoid(g[:, 0:H])
            f = jax.nn.sigmoid(g[:, H:2 * H])
            gg = jnp.tanh(g[:, 2 * H:3 * H])
            o = jax.nn.sigmoid(g[:, 3 * H:4 * H])
            c_new = f * c + i * gg
            h_new = o * jnp.tanh(c_new)
            return (h_new, c_new), None
        (h, c), _ = lax.scan(step, (h, c), xs)
        return h, c

    hf, cf = run_dir(emb, h0[0], c0[0], w_ih_t[0], w_hh_t[0], bias[0])
    hb, cb = run_dir(emb[::-1], h0[1], c0[1], w_ih_t[1], w_hh_t[1], bias[1])
    return jnp.stack([hf, hb]), jnp.stack([cf, cb])


# --------------------------------- main -------------------------------------

if __name__ == "__main__":
    T, B, E, H = 8, 4, 32, 32
    key = jax.random.PRNGKey(0)
    k_mod, k_ids, k_h, k_c = jax.random.split(key, 4)

    net = WordAttNetPallas(k_mod, vocab_rows=20, embed_size=E, hidden_size=H)

    input_ids = jax.random.randint(k_ids, (T, B), 0, net.dict_len, jnp.int32)
    h0 = 0.1 * jax.random.normal(k_h, (2, B, H), jnp.float32)
    c0 = 0.1 * jax.random.normal(k_c, (2, B, H), jnp.float32)

    output, (h_n, c_n) = net.forward(input_ids, (h0, c0))
    jax.block_until_ready((output, h_n, c_n))

    assert output.shape == (1, B, 2 * H)
    assert h_n.shape == (2, B, H) and c_n.shape == (2, B, H)

    # Sanity check against a pure-JAX f32 reference (bf16 MXU operands => loose tol).
    emb = net.embedding[input_ids].astype(jnp.float32)
    h_ref, c_ref = _lstm_ref(emb, h0, c0, net.w_ih_t, net.w_hh_t, net.bias, H)
    assert jnp.allclose(h_n, h_ref, atol=2e-2, rtol=2e-2)
    assert jnp.allclose(c_n, c_ref, atol=2e-2, rtol=2e-2)
    assert jnp.allclose(output[0],
                        jnp.concatenate([h_ref[0], h_ref[1]], axis=1),
                        atol=2e-2, rtol=2e-2)

    print("KERNEL_OK")
</pallas_src>

<mosaic_0001>
module attributes {stable_mosaic.version = 11 : i64} {
  func.func @_bilstm_fused_kernel(%arg0: memref<64x64xbf16, #tpu.memory_space<vmem>>, %arg1: memref<8x32xf32, #tpu.memory_space<vmem>>, %arg2: memref<8x32xf32, #tpu.memory_space<vmem>>, %arg3: memref<64x128xbf16, #tpu.memory_space<vmem>>, %arg4: memref<64x128xbf16, #tpu.memory_space<vmem>>, %arg5: memref<8x128xf32, #tpu.memory_space<vmem>>, %arg6: memref<4x64xf32, #tpu.memory_space<vmem>>, %arg7: memref<8x64xf32, #tpu.memory_space<vmem>>) attributes {dimension_semantics = [], scalar_prefetch = 0 : i64, scratch_operands = 0 : i64, tpu.core_type = #tpu.core_type<tc>} {
    %c0 = arith.constant 0 : index
    %c0_0 = arith.constant 0 : index
    %0 = vector.load %arg0[%c0, %c0_0] : memref<64x64xbf16, #tpu.memory_space<vmem>>, vector<64x64xbf16>
    %c0_1 = arith.constant 0 : index
    %c0_2 = arith.constant 0 : index
    %1 = vector.load %arg3[%c0_1, %c0_2] : memref<64x128xbf16, #tpu.memory_space<vmem>>, vector<64x128xbf16>
    %cst = arith.constant dense<0.000000e+00> : vector<64x128xf32>
    %2 = tpu.matmul %0, %1, %cst {dimension_numbers = #tpu.dot_dimension_numbers<[1], [0], [0], [1], [0, 0, 1, 1], [], []>} : vector<64x64xbf16>, vector<64x128xbf16>, vector<64x128xf32> -> vector<64x128xf32>
    %3 = vector.shape_cast %2 : vector<64x128xf32> to vector<8x8x128xf32>
    %c0_3 = arith.constant 0 : index
    %c0_4 = arith.constant 0 : index
    %4 = vector.load %arg5[%c0_3, %c0_4] : memref<8x128xf32, #tpu.memory_space<vmem>>, vector<8x128xf32>
    %5 = vector.shape_cast %4 : vector<8x128xf32> to vector<1x8x128xf32>
    %6 = vector.broadcast %5 : vector<1x8x128xf32> to vector<8x8x128xf32>
    %7 = arith.addf %3, %6 : vector<8x8x128xf32>
    %c0_5 = arith.constant 0 : index
    %c0_6 = arith.constant 0 : index
    %8 = vector.load %arg4[%c0_5, %c0_6] : memref<64x128xbf16, #tpu.memory_space<vmem>>, vector<64x128xbf16>
    %9 = tpu.iota {dimensions = array<i32: 0>} : vector<8x64xi32>
    %10 = tpu.iota {dimensions = array<i32: 1>} : vector<8x64xi32>
    %c4_i32 = arith.constant 4 : i32
    %11 = vector.broadcast %c4_i32 : i32 to vector<8x64xi32>
    %12 = arith.cmpi slt, %9, %11 : vector<8x64xi32>
    %c32_i32 = arith.constant 32 : i32
    %13 = vector.broadcast %c32_i32 : i32 to vector<8x64xi32>
    %14 = arith.cmpi slt, %10, %13 : vector<8x64xi32>
    %15 = arith.andi %12, %14 : vector<8x64xi1>
    %c4_i32_7 = arith.constant 4 : i32
    %16 = vector.broadcast %c4_i32_7 : i32 to vector<8x64xi32>
    %17 = arith.cmpi sge, %9, %16 : vector<8x64xi32>
    %c32_i32_8 = arith.constant 32 : i32
    %18 = vector.broadcast %c32_i32_8 : i32 to vector<8x64xi32>
    %19 = arith.cmpi sge, %10, %18 : vector<8x64xi32>
    %20 = arith.andi %17, %19 : vector<8x64xi1>
    %21 = arith.ori %15, %20 : vector<8x64xi1>
    %22 = tpu.iota {dimensions = array<i32: 1>} : vector<8x128xi32>
    %c64_i32 = arith.constant 64 : i32
    %23 = vector.broadcast %c64_i32 : i32 to vector<8x128xi32>
    %24 = arith.cmpi sge, %22, %23 : vector<8x128xi32>
    %c96_i32 = arith.constant 96 : i32
    %25 = vector.broadcast %c96_i32 : i32 to vector<8x128xi32>
    %26 = arith.cmpi slt, %22, %25 : vector<8x128xi32>
    %27 = arith.andi %24, %26 : vector<8x128xi1>
    %c0_9 = arith.constant 0 : index
    %c0_10 = arith.constant 0 : index
    %28 = vector.load %arg1[%c0_9, %c0_10] : memref<8x32xf32, #tpu.memory_space<vmem>>, vector<8x32xf32>
    %c0_11 = arith.constant 0 : index
    %c0_12 = arith.constant 0 : index
    %29 = vector.load %arg2[%c0_11, %c0_12] : memref<8x32xf32, #tpu.memory_space<vmem>>, vector<8x32xf32>
    %30 = tpu.concatenate %28, %28 in 1 : vector<8x32xf32>, vector<8x32xf32> -> vector<8x64xf32>
    %cst_13 = arith.constant 0.000000e+00 : f32
    %31 = vector.broadcast %cst_13 : f32 to vector<8x64xf32>
    %32 = arith.select %21, %30, %31 : vector<8x64xi1>, vector<8x64xf32>
    %33 = arith.truncf %32 : vector<8x64xf32> to vector<8x64xbf16>
    %cst_14 = arith.constant dense<0.000000e+00> : vector<8x128xf32>
    %34 = tpu.matmul %33, %8, %cst_14 {dimension_numbers = #tpu.dot_dimension_numbers<[1], [0], [0], [1], [0, 0, 1, 1], [], []>} : vector<8x64xbf16>, vector<64x128xbf16>, vector<8x128xf32> -> vector<8x128xf32>
    %35 = vector.extract_strided_slice %7 {offsets = [0, 0, 0], sizes = [1, 8, 128], strides = [1, 1, 1]} : vector<8x8x128xf32> to vector<1x8x128xf32>
    %36 = vector.shape_cast %35 : vector<1x8x128xf32> to vector<8x128xf32>
    %37 = arith.addf %36, %34 : vector<8x128xf32>
    %38 = math.tanh %37 : vector<8x128xf32>
    %39 = arith.negf %37 : vector<8x128xf32>
    %40 = math.exp %39 : vector<8x128xf32>
    %cst_15 = arith.constant 1.000000e+00 : f32
    %41 = vector.broadcast %cst_15 : f32 to vector<8x128xf32>
    %42 = arith.addf %41, %40 : vector<8x128xf32>
    %43 = arith.divf %41, %42 : vector<8x128xf32>
    %44 = arith.select %27, %38, %43 : vector<8x128xi1>, vector<8x128xf32>
    %45 = vector.extract_strided_slice %44 {offsets = [0, 0], sizes = [8, 32], strides = [1, 1]} : vector<8x128xf32> to vector<8x32xf32>
    %46 = vector.extract_strided_slice %44 {offsets = [0, 32], sizes = [8, 32], strides = [1, 1]} : vector<8x128xf32> to vector<8x32xf32>
    %47 = vector.extract_strided_slice %44 {offsets = [0, 64], sizes = [8, 32], strides = [1, 1]} : vector<8x128xf32> to vector<8x32xf32>
    %48 = vector.extract_strided_slice %44 {offsets = [0, 96], sizes = [8, 32], strides = [1, 1]} : vector<8x128xf32> to vector<8x32xf32>
    %49 = arith.mulf %46, %29 : vector<8x32xf32>
    %50 = arith.mulf %45, %47 : vector<8x32xf32>
    %51 = arith.addf %49, %50 : vector<8x32xf32>
    %52 = math.tanh %51 : vector<8x32xf32>
    %53 = arith.mulf %48, %52 : vector<8x32xf32>
    %54 = tpu.concatenate %53, %53 in 1 : vector<8x32xf32>, vector<8x32xf32> -> vector<8x64xf32>
    %cst_16 = arith.constant 0.000000e+00 : f32
    %55 = vector.broadcast %cst_16 : f32 to vector<8x64xf32>
    %56 = arith.select %21, %54, %55 : vector<8x64xi1>, vector<8x64xf32>
    %57 = arith.truncf %56 : vector<8x64xf32> to vector<8x64xbf16>
    %cst_17 = arith.constant dense<0.000000e+00> : vector<8x128xf32>
    %58 = tpu.matmul %57, %8, %cst_17 {dimension_numbers = #tpu.dot_dimension_numbers<[1], [0], [0], [1], [0, 0, 1, 1], [], []>} : vector<8x64xbf16>, vector<64x128xbf16>, vector<8x128xf32> -> vector<8x128xf32>
    %59 = vector.extract_strided_slice %7 {offsets = [1, 0, 0], sizes = [1, 8, 128], strides = [1, 1, 1]} : vector<8x8x128xf32> to vector<1x8x128xf32>
    %60 = vector.shape_cast %59 : vector<1x8x128xf32> to vector<8x128xf32>
    %61 = arith.addf %60, %58 : vector<8x128xf32>
    %62 = math.tanh %61 : vector<8x128xf32>
    %63 = arith.negf %61 : vector<8x128xf32>
    %64 = math.exp %63 : vector<8x128xf32>
    %cst_18 = arith.constant 1.000000e+00 : f32
    %65 = vector.broadcast %cst_18 : f32 to vector<8x128xf32>
    %66 = arith.addf %65, %64 : vector<8x128xf32>
    %67 = arith.divf %65, %66 : vector<8x128xf32>
    %68 = arith.select %27, %62, %67 : vector<8x128xi1>, vector<8x128xf32>
    %69 = vector.extract_strided_slice %68 {offsets = [0, 0], sizes = [8, 32], strides = [1, 1]} : vector<8x128xf32> to vector<8x32xf32>
    %70 = vector.extract_strided_slice %68 {offsets = [0, 32], sizes = [8, 32], strides = [1, 1]} : vector<8x128xf32> to vector<8x32xf32>
    %71 = vector.extract_strided_slice %68 {offsets = [0, 64], sizes = [8, 32], strides = [1, 1]} : vector<8x128xf32> to vector<8x32xf32>
    %72 = vector.extract_strided_slice %68 {offsets = [0, 96], sizes = [8, 32], strides = [1, 1]} : vector<8x128xf32> to vector<8x32xf32>
    %73 = arith.mulf %70, %51 : vector<8x32xf32>
    %74 = arith.mulf %69, %71 : vector<8x32xf32>
    %75 = arith.addf %73, %74 : vector<8x32xf32>
    %76 = math.tanh %75 : vector<8x32xf32>
    %77 = arith.mulf %72, %76 : vector<8x32xf32>
    %78 = tpu.concatenate %77, %77 in 1 : vector<8x32xf32>, vector<8x32xf32> -> vector<8x64xf32>
    %cst_19 = arith.constant 0.000000e+00 : f32
    %79 = vector.broadcast %cst_19 : f32 to vector<8x64xf32>
    %80 = arith.select %21, %78, %79 : vector<8x64xi1>, vector<8x64xf32>
    %81 = arith.truncf %80 : vector<8x64xf32> to vector<8x64xbf16>
    %cst_20 = arith.constant dense<0.000000e+00> : vector<8x128xf32>
    %82 = tpu.matmul %81, %8, %cst_20 {dimension_numbers = #tpu.dot_dimension_numbers<[1], [0], [0], [1], [0, 0, 1, 1], [], []>} : vector<8x64xbf16>, vector<64x128xbf16>, vector<8x128xf32> -> vector<8x128xf32>
    %83 = vector.extract_strided_slice %7 {offsets = [2, 0, 0], sizes = [1, 8, 128], strides = [1, 1, 1]} : vector<8x8x128xf32> to vector<1x8x128xf32>
    %84 = vector.shape_cast %83 : vector<1x8x128xf32> to vector<8x128xf32>
    %85 = arith.addf %84, %82 : vector<8x128xf32>
    %86 = math.tanh %85 : vector<8x128xf32>
    %87 = arith.negf %85 : vector<8x128xf32>
    %88 = math.exp %87 : vector<8x128xf32>
    %cst_21 = arith.constant 1.000000e+00 : f32
    %89 = vector.broadcast %cst_21 : f32 to vector<8x128xf32>
    %90 = arith.addf %89, %88 : vector<8x128xf32>
    %91 = arith.divf %89, %90 : vector<8x128xf32>
    %92 = arith.select %27, %86, %91 : vector<8x128xi1>, vector<8x128xf32>
    %93 = vector.extract_strided_slice %92 {offsets = [0, 0], sizes = [8, 32], strides = [1, 1]} : vector<8x128xf32> to vector<8x32xf32>
    %94 = vector.extract_strided_slice %92 {offsets = [0, 32], sizes = [8, 32], strides = [1, 1]} : vector<8x128xf32> to vector<8x32xf32>
    %95 = vector.extract_strided_slice %92 {offsets = [0, 64], sizes = [8, 32], strides = [1, 1]} : vector<8x128xf32> to vector<8x32xf32>
    %96 = vector.extract_strided_slice %92 {offsets = [0, 96], sizes = [8, 32], strides = [1, 1]} : vector<8x128xf32> to vector<8x32xf32>
    %97 = arith.mulf %94, %75 : vector<8x32xf32>
    %98 = arith.mulf %93, %95 : vector<8x32xf32>
    %99 = arith.addf %97, %98 : vector<8x32xf32>
    %100 = math.tanh %99 : vector<8x32xf32>
    %101 = arith.mulf %96, %100 : vector<8x32xf32>
    %102 = tpu.concatenate %101, %101 in 1 : vector<8x32xf32>, vector<8x32xf32> -> vector<8x64xf32>
    %cst_22 = arith.constant 0.000000e+00 : f32
    %103 = vector.broadcast %cst_22 : f32 to vector<8x64xf32>
    %104 = arith.select %21, %102, %103 : vector<8x64xi1>, vector<8x64xf32>
    %105 = arith.truncf %104 : vector<8x64xf32> to vector<8x64xbf16>
    %cst_23 = arith.constant dense<0.000000e+00> : vector<8x128xf32>
    %106 = tpu.matmul %105, %8, %cst_23 {dimension_numbers = #tpu.dot_dimension_numbers<[1], [0], [0], [1], [0, 0, 1, 1], [], []>} : vector<8x64xbf16>, vector<64x128xbf16>, vector<8x128xf32> -> vector<8x128xf32>
    %107 = vector.extract_strided_slice %7 {offsets = [3, 0, 0], sizes = [1, 8, 128], strides = [1, 1, 1]} : vector<8x8x128xf32> to vector<1x8x128xf32>
    %108 = vector.shape_cast %107 : vector<1x8x128xf32> to vector<8x128xf32>
    %109 = arith.addf %108, %106 : vector<8x128xf32>
    %110 = math.tanh %109 : vector<8x128xf32>
    %111 = arith.negf %109 : vector<8x128xf32>
    %112 = math.exp %111 : vector<8x128xf32>
    %cst_24 = arith.constant 1.000000e+00 : f32
    %113 = vector.broadcast %cst_24 : f32 to vector<8x128xf32>
    %114 = arith.addf %113, %112 : vector<8x128xf32>
    %115 = arith.divf %113, %114 : vector<8x128xf32>
    %116 = arith.select %27, %110, %115 : vector<8x128xi1>, vector<8x128xf32>
    %117 = vector.extract_strided_slice %116 {offsets = [0, 0], sizes = [8, 32], strides = [1, 1]} : vector<8x128xf32> to vector<8x32xf32>
    %118 = vector.extract_strided_slice %116 {offsets = [0, 32], sizes = [8, 32], strides = [1, 1]} : vector<8x128xf32> to vector<8x32xf32>
    %119 = vector.extract_strided_slice %116 {offsets = [0, 64], sizes = [8, 32], strides = [1, 1]} : vector<8x128xf32> to vector<8x32xf32>
    %120 = vector.extract_strided_slice %116 {offsets = [0, 96], sizes = [8, 32], strides = [1, 1]} : vector<8x128xf32> to vector<8x32xf32>
    %121 = arith.mulf %118, %99 : vector<8x32xf32>
    %122 = arith.mulf %117, %119 : vector<8x32xf32>
    %123 = arith.addf %121, %122 : vector<8x32xf32>
    %124 = math.tanh %123 : vector<8x32xf32>
    %125 = arith.mulf %120, %124 : vector<8x32xf32>
    %126 = tpu.concatenate %125, %125 in 1 : vector<8x32xf32>, vector<8x32xf32> -> vector<8x64xf32>
    %cst_25 = arith.constant 0.000000e+00 : f32
    %127 = vector.broadcast %cst_25 : f32 to vector<8x64xf32>
    %128 = arith.select %21, %126, %127 : vector<8x64xi1>, vector<8x64xf32>
    %129 = arith.truncf %128 : vector<8x64xf32> to vector<8x64xbf16>
    %cst_26 = arith.constant dense<0.000000e+00> : vector<8x128xf32>
    %130 = tpu.matmul %129, %8, %cst_26 {dimension_numbers = #tpu.dot_dimension_numbers<[1], [0], [0], [1], [0, 0, 1, 1], [], []>} : vector<8x64xbf16>, vector<64x128xbf16>, vector<8x128xf32> -> vector<8x128xf32>
    %131 = vector.extract_strided_slice %7 {offsets = [4, 0, 0], sizes = [1, 8, 128], strides = [1, 1, 1]} : vector<8x8x128xf32> to vector<1x8x128xf32>
    %132 = vector.shape_cast %131 : vector<1x8x128xf32> to vector<8x128xf32>
    %133 = arith.addf %132, %130 : vector<8x128xf32>
    %134 = math.tanh %133 : vector<8x128xf32>
    %135 = arith.negf %133 : vector<8x128xf32>
    %136 = math.exp %135 : vector<8x128xf32>
    %cst_27 = arith.constant 1.000000e+00 : f32
    %137 = vector.broadcast %cst_27 : f32 to vector<8x128xf32>
    %138 = arith.addf %137, %136 : vector<8x128xf32>
    %139 = arith.divf %137, %138 : vector<8x128xf32>
    %140 = arith.select %27, %134, %139 : vector<8x128xi1>, vector<8x128xf32>
    %141 = vector.extract_strided_slice %140 {offsets = [0, 0], sizes = [8, 32], strides = [1, 1]} : vector<8x128xf32> to vector<8x32xf32>
    %142 = vector.extract_strided_slice %140 {offsets = [0, 32], sizes = [8, 32], strides = [1, 1]} : vector<8x128xf32> to vector<8x32xf32>
    %143 = vector.extract_strided_slice %140 {offsets = [0, 64], sizes = [8, 32], strides = [1, 1]} : vector<8x128xf32> to vector<8x32xf32>
    %144 = vector.extract_strided_slice %140 {offsets = [0, 96], sizes = [8, 32], strides = [1, 1]} : vector<8x128xf32> to vector<8x32xf32>
    %145 = arith.mulf %142, %123 : vector<8x32xf32>
    %146 = arith.mulf %141, %143 : vector<8x32xf32>
    %147 = arith.addf %145, %146 : vector<8x32xf32>
    %148 = math.tanh %147 : vector<8x32xf32>
    %149 = arith.mulf %144, %148 : vector<8x32xf32>
    %150 = tpu.concatenate %149, %149 in 1 : vector<8x32xf32>, vector<8x32xf32> -> vector<8x64xf32>
    %cst_28 = arith.constant 0.000000e+00 : f32
    %151 = vector.broadcast %cst_28 : f32 to vector<8x64xf32>
    %152 = arith.select %21, %150, %151 : vector<8x64xi1>, vector<8x64xf32>
    %153 = arith.truncf %152 : vector<8x64xf32> to vector<8x64xbf16>
    %cst_29 = arith.constant dense<0.000000e+00> : vector<8x128xf32>
    %154 = tpu.matmul %153, %8, %cst_29 {dimension_numbers = #tpu.dot_dimension_numbers<[1], [0], [0], [1], [0, 0, 1, 1], [], []>} : vector<8x64xbf16>, vector<64x128xbf16>, vector<8x128xf32> -> vector<8x128xf32>
    %155 = vector.extract_strided_slice %7 {offsets = [5, 0, 0], sizes = [1, 8, 128], strides = [1, 1, 1]} : vector<8x8x128xf32> to vector<1x8x128xf32>
    %156 = vector.shape_cast %155 : vector<1x8x128xf32> to vector<8x128xf32>
    %157 = arith.addf %156, %154 : vector<8x128xf32>
    %158 = math.tanh %157 : vector<8x128xf32>
    %159 = arith.negf %157 : vector<8x128xf32>
    %160 = math.exp %159 : vector<8x128xf32>
    %cst_30 = arith.constant 1.000000e+00 : f32
    %161 = vector.broadcast %cst_30 : f32 to vector<8x128xf32>
    %162 = arith.addf %161, %160 : vector<8x128xf32>
    %163 = arith.divf %161, %162 : vector<8x128xf32>
    %164 = arith.select %27, %158, %163 : vector<8x128xi1>, vector<8x128xf32>
    %165 = vector.extract_strided_slice %164 {offsets = [0, 0], sizes = [8, 32], strides = [1, 1]} : vector<8x128xf32> to vector<8x32xf32>
    %166 = vector.extract_strided_slice %164 {offsets = [0, 32], sizes = [8, 32], strides = [1, 1]} : vector<8x128xf32> to vector<8x32xf32>
    %167 = vector.extract_strided_slice %164 {offsets = [0, 64], sizes = [8, 32], strides = [1, 1]} : vector<8x128xf32> to vector<8x32xf32>
    %168 = vector.extract_strided_slice %164 {offsets = [0, 96], sizes = [8, 32], strides = [1, 1]} : vector<8x128xf32> to vector<8x32xf32>
    %169 = arith.mulf %166, %147 : vector<8x32xf32>
    %170 = arith.mulf %165, %167 : vector<8x32xf32>
    %171 = arith.addf %169, %170 : vector<8x32xf32>
    %172 = math.tanh %171 : vector<8x32xf32>
    %173 = arith.mulf %168, %172 : vector<8x32xf32>
    %174 = tpu.concatenate %173, %173 in 1 : vector<8x32xf32>, vector<8x32xf32> -> vector<8x64xf32>
    %cst_31 = arith.constant 0.000000e+00 : f32
    %175 = vector.broadcast %cst_31 : f32 to vector<8x64xf32>
    %176 = arith.select %21, %174, %175 : vector<8x64xi1>, vector<8x64xf32>
    %177 = arith.truncf %176 : vector<8x64xf32> to vector<8x64xbf16>
    %cst_32 = arith.constant dense<0.000000e+00> : vector<8x128xf32>
    %178 = tpu.matmul %177, %8, %cst_32 {dimension_numbers = #tpu.dot_dimension_numbers<[1], [0], [0], [1], [0, 0, 1, 1], [], []>} : vector<8x64xbf16>, vector<64x128xbf16>, vector<8x128xf32> -> vector<8x128xf32>
    %179 = vector.extract_strided_slice %7 {offsets = [6, 0, 0], sizes = [1, 8, 128], strides = [1, 1, 1]} : vector<8x8x128xf32> to vector<1x8x128xf32>
    %180 = vector.shape_cast %179 : vector<1x8x128xf32> to vector<8x128xf32>
    %181 = arith.addf %180, %178 : vector<8x128xf32>
    %182 = math.tanh %181 : vector<8x128xf32>
    %183 = arith.negf %181 : vector<8x128xf32>
    %184 = math.exp %183 : vector<8x128xf32>
    %cst_33 = arith.constant 1.000000e+00 : f32
    %185 = vector.broadcast %cst_33 : f32 to vector<8x128xf32>
    %186 = arith.addf %185, %184 : vector<8x128xf32>
    %187 = arith.divf %185, %186 : vector<8x128xf32>
    %188 = arith.select %27, %182, %187 : vector<8x128xi1>, vector<8x128xf32>
    %189 = vector.extract_strided_slice %188 {offsets = [0, 0], sizes = [8, 32], strides = [1, 1]} : vector<8x128xf32> to vector<8x32xf32>
    %190 = vector.extract_strided_slice %188 {offsets = [0, 32], sizes = [8, 32], strides = [1, 1]} : vector<8x128xf32> to vector<8x32xf32>
    %191 = vector.extract_strided_slice %188 {offsets = [0, 64], sizes = [8, 32], strides = [1, 1]} : vector<8x128xf32> to vector<8x32xf32>
    %192 = vector.extract_strided_slice %188 {offsets = [0, 96], sizes = [8, 32], strides = [1, 1]} : vector<8x128xf32> to vector<8x32xf32>
    %193 = arith.mulf %190, %171 : vector<8x32xf32>
    %194 = arith.mulf %189, %191 : vector<8x32xf32>
    %195 = arith.addf %193, %194 : vector<8x32xf32>
    %196 = math.tanh %195 : vector<8x32xf32>
    %197 = arith.mulf %192, %196 : vector<8x32xf32>
    %198 = tpu.concatenate %197, %197 in 1 : vector<8x32xf32>, vector<8x32xf32> -> vector<8x64xf32>
    %cst_34 = arith.constant 0.000000e+00 : f32
    %199 = vector.broadcast %cst_34 : f32 to vector<8x64xf32>
    %200 = arith.select %21, %198, %199 : vector<8x64xi1>, vector<8x64xf32>
    %201 = arith.truncf %200 : vector<8x64xf32> to vector<8x64xbf16>
    %cst_35 = arith.constant dense<0.000000e+00> : vector<8x128xf32>
    %202 = tpu.matmul %201, %8, %cst_35 {dimension_numbers = #tpu.dot_dimension_numbers<[1], [0], [0], [1], [0, 0, 1, 1], [], []>} : vector<8x64xbf16>, vector<64x128xbf16>, vector<8x128xf32> -> vector<8x128xf32>
    %203 = vector.extract_strided_slice %7 {offsets = [7, 0, 0], sizes = [1, 8, 128], strides = [1, 1, 1]} : vector<8x8x128xf32> to vector<1x8x128xf32>
    %204 = vector.shape_cast %203 : vector<1x8x128xf32> to vector<8x128xf32>
    %205 = arith.addf %204, %202 : vector<8x128xf32>
    %206 = math.tanh %205 : vector<8x128xf32>
    %207 = arith.negf %205 : vector<8x128xf32>
    %208 = math.exp %207 : vector<8x128xf32>
    %cst_36 = arith.constant 1.000000e+00 : f32
    %209 = vector.broadcast %cst_36 : f32 to vector<8x128xf32>
    %210 = arith.addf %209, %208 : vector<8x128xf32>
    %211 = arith.divf %209, %210 : vector<8x128xf32>
    %212 = arith.select %27, %206, %211 : vector<8x128xi1>, vector<8x128xf32>
    %213 = vector.extract_strided_slice %212 {offsets = [0, 0], sizes = [8, 32], strides = [1, 1]} : vector<8x128xf32> to vector<8x32xf32>
    %214 = vector.extract_strided_slice %212 {offsets = [0, 32], sizes = [8, 32], strides = [1, 1]} : vector<8x128xf32> to vector<8x32xf32>
    %215 = vector.extract_strided_slice %212 {offsets = [0, 64], sizes = [8, 32], strides = [1, 1]} : vector<8x128xf32> to vector<8x32xf32>
    %216 = vector.extract_strided_slice %212 {offsets = [0, 96], sizes = [8, 32], strides = [1, 1]} : vector<8x128xf32> to vector<8x32xf32>
    %217 = arith.mulf %214, %195 : vector<8x32xf32>
    %218 = arith.mulf %213, %215 : vector<8x32xf32>
    %219 = arith.addf %217, %218 : vector<8x32xf32>
    %220 = math.tanh %219 : vector<8x32xf32>
    %221 = arith.mulf %216, %220 : vector<8x32xf32>
    %222 = vector.extract_strided_slice %221 {offsets = [0, 0], sizes = [4, 32], strides = [1, 1]} : vector<8x32xf32> to vector<4x32xf32>
    %223 = vector.extract_strided_slice %221 {offsets = [4, 0], sizes = [4, 32], strides = [1, 1]} : vector<8x32xf32> to vector<4x32xf32>
    %224 = tpu.concatenate %222, %223 in 1 : vector<4x32xf32>, vector<4x32xf32> -> vector<4x64xf32>
    %c0_37 = arith.constant 0 : index
    %c0_38 = arith.constant 0 : index
    %225 = vector.load %arg6[%c0_37, %c0_38] : memref<4x64xf32, #tpu.memory_space<vmem>>, vector<4x64xf32>
    tpu.vector_store %arg6[%c0_37, %c0_38], %224 {strides = array<i32>} : memref<4x64xf32, #tpu.memory_space<vmem>>, vector<4x64xf32>,
    %226 = tpu.concatenate %221, %219 in 1 : vector<8x32xf32>, vector<8x32xf32> -> vector<8x64xf32>
    %c0_39 = arith.constant 0 : index
    %c0_40 = arith.constant 0 : index
    %227 = vector.load %arg7[%c0_39, %c0_40] : memref<8x64xf32, #tpu.memory_space<vmem>>, vector<8x64xf32>
    tpu.vector_store %arg7[%c0_39, %c0_40], %226 {strides = array<i32>} : memref<8x64xf32, #tpu.memory_space<vmem>>, vector<8x64xf32>,
    return
  }
}

</mosaic_0001>

<bundles_post_ra>
// kernel: tpu_custom_call.1
= control target key start
LH: loop header
LB: loop body
LE: loop exit
PB: predicated region body
PF: predicated region fallthrough
CT: control target
= control target key end

     0   :  { %13 = vsyncpa [#allocation3], 0  ;;  %s1779_s0 = inlined_call_operand.hbm [shape: bf16[64,64], index: 0, kind: input, shape index: {}]   ;;  %s1780_s1 = inlined_call_operand.hbm [shape: f32[8,32], index: 1, kind: input, shape index: {}]   ;;  %s1781_s2 = inlined_call_operand.hbm [shape: f32[8,32], index: 2, kind: input, shape index: {}]   ;;  %s1782_s3 = inlined_call_operand.hbm [shape: bf16[64,128], index: 3, kind: input, shape index: {}]   ;;  %s1783_s4 = inlined_call_operand.hbm [shape: bf16[64,128], index: 4, kind: input, shape index: {}]   ;;  %s1784_s5 = inlined_call_operand.vmem [shape: f32[8,128], index: 5, kind: input, shape index: {}]   ;;  %s1785_s6 = inlined_call_operand.hbm [shape: f32[4,64], index: 6, kind: output, shape index: {0}]   ;;  %s1786_s7 = inlined_call_operand.hbm [shape: f32[8,64], index: 7, kind: output, shape index: {1}]  }
   0x1   :  { %14 = vsyncpa [#allocation6], 0 }
   0x2   :  { %15 = vsyncpa [#allocation9], 0 }
   0x3   :  { %16 = vsyncpa [#allocation4], 0 }
   0x4   :  { %17 = vsyncpa [#allocation13], 0  ;;  %s1409_s24 = smov [#allocation5]   ;;  %s1245_s28 = scalar_lea.hbm %s1780_s1, 128 }
   0x5   :  { %s36_s25 = sshll.u32 %s1409_s24, 4  ;;  %p1246_p0 = scmp.ne.s32.totalorder %s1780_s1, %s1245_s28  ;;  %s37_s25 = int_to_ptr.vmem [resolvable:$true] %s36_s25 }
   0x6   :  { %p1249_p1 = scmp.lt.u32.totalorder %s1245_s28, %s1780_s1 }
   0x8   :  { %p1251_p2 = pnand %p1249_p1, %p1246_p0 }
   0xa   :  { %1254 = shalt.err (!%p1251_p2)
}
   0xb   :  { %s1255_s10 = scalar_lea.vmem %s37_s25, 128  ;;  %p1260_p4 = scmp.lt.s32.totalorder %s37_s25, %s37_s25 }
   0xc   :  { %p1256_p3 = scmp.ne.s32.totalorder %s37_s25, %s1255_s10  ;;  %p1261_p5 = scmp.lt.s32.totalorder %s1255_s10, %s1255_s10 }
   0xe   :  { %p1262_p6 = por %p1261_p5, %p1260_p4 }
  0x10   :  { %p1263_p7 = pnand %p1262_p6, %p1256_p3 }
  0x12   :  { %1266 = shalt.err (!%p1263_p7)
}
  0x13   :  { %39 = dma.hbm_to_vmem [thread:$0]  %s1780_s1, 128, %s37_s25, [#allocation6]  }
  0x14   :  { %s1410_s13 = smov [#allocation8]   ;;  %s1411_s15 = smov [#allocation2]  }
  0x15   :  { %s55_s14 = sshll.u32 %s1410_s13, 4  ;;  %s23_s16 = sshll.u32 %s1411_s15, 4  ;;  %s56_s14 = int_to_ptr.vmem [resolvable:$true] %s55_s14  ;;  %s24_s16 = int_to_ptr.vmem [resolvable:$true] %s23_s16 }
  0x16   :  { %s1267_s19 = scalar_lea.hbm %s1782_s3, 512 }
  0x17   :  { %p1268_p8 = scmp.ne.s32.totalorder %s1782_s3, %s1267_s19  ;;  %p1271_p9 = scmp.lt.u32.totalorder %s1267_s19, %s1782_s3 }
  0x19   :  { %p1273_p10 = pnand %p1271_p9, %p1268_p8 }
  0x1b   :  { %1276 = shalt.err (!%p1273_p10)
}
  0x1c   :  { %s1277_s1 = scalar_lea.vmem %s56_s14, 512  ;;  %p1282_p12 = scmp.lt.s32.totalorder %s56_s14, %s56_s14 }
  0x1d   :  { %p1278_p11 = scmp.ne.s32.totalorder %s56_s14, %s1277_s1  ;;  %p1283_p13 = scmp.lt.s32.totalorder %s1277_s1, %s1277_s1 }
  0x1f   :  { %p1284_p0 = por %p1283_p13, %p1282_p12 }
  0x21   :  { %p1285_p1 = pnand %p1284_p0, %p1278_p11 }
  0x23   :  { %1288 = shalt.err (!%p1285_p1)
}
  0x24   :  { %s1412_s24 = smov 64   ;;  %s1413_s25 = smov 4  }
  0x25   :  { %61 = dma.hbm_to_vmem [thread:$0]  %s1782_s3, 512, %s56_s14, [#allocation9], %s1412_s24, %s1412_s24, %s1413_s25  }
  0x26   :  { %s1289_s30 = scalar_lea.hbm %s1779_s0, 512 }
  0x27   :  { %p1290_p2 = scmp.ne.s32.totalorder %s1779_s0, %s1289_s30  ;;  %p1293_p3 = scmp.lt.u32.totalorder %s1289_s30, %s1779_s0 }
  0x29   :  { %p1295_p4 = pnand %p1293_p3, %p1290_p2 }
  0x2b   :  { %1298 = shalt.err (!%p1295_p4)
}
  0x2c   :  { %s1299_s12 = scalar_lea.vmem %s24_s16, 512  ;;  %p1304_p6 = scmp.lt.s32.totalorder %s24_s16, %s24_s16 }
  0x2d   :  { %p1300_p5 = scmp.ne.s32.totalorder %s24_s16, %s1299_s12  ;;  %p1305_p7 = scmp.lt.s32.totalorder %s1299_s12, %s1299_s12 }
  0x2f   :  { %p1306_p8 = por %p1305_p7, %p1304_p6 }
  0x31   :  { %p1307_p9 = pnand %p1306_p8, %p1300_p5 }
  0x33   :  { %1310 = shalt.err (!%p1307_p9)
}
  0x34   :  { %29 = dma.hbm_to_vmem [thread:$0]  %s1779_s0, 512, %s24_s16, [#allocation3], %s1412_s24, %s1412_s24, %s1413_s25  }
  0x35   :  { %s1414_s14 = smov [#allocation7]   ;;  %s1415_s17 = smov [#allocation10]  }
  0x36   :  { %s46_s15 = sshll.u32 %s1414_s14, 4  ;;  %s67_s18 = sshll.u32 %s1415_s17, 4  ;;  %s47_s15 = int_to_ptr.vmem [resolvable:$true] %s46_s15  ;;  %s68_s18 = int_to_ptr.vmem [resolvable:$true] %s67_s18 }
  0x37   :  { %s1311_s21 = scalar_lea.hbm %s1781_s2, 128 }
  0x38   :  { %p1312_p10 = scmp.ne.s32.totalorder %s1781_s2, %s1311_s21  ;;  %p1315_p11 = scmp.lt.u32.totalorder %s1311_s21, %s1781_s2 }
  0x3a   :  { %p1317_p12 = pnand %p1315_p11, %p1312_p10 }
  0x3c   :  { %1320 = shalt.err (!%p1317_p12)
}
  0x3d   :  { %s1321_s0 = scalar_lea.vmem %s47_s15, 128  ;;  %p1326_p0 = scmp.lt.s32.totalorder %s47_s15, %s47_s15 }
  0x3e   :  { %p1322_p13 = scmp.ne.s32.totalorder %s47_s15, %s1321_s0  ;;  %p1327_p1 = scmp.lt.s32.totalorder %s1321_s0, %s1321_s0 }
  0x40   :  { %p1328_p2 = por %p1327_p1, %p1326_p0 }
  0x42   :  { %p1329_p3 = pnand %p1328_p2, %p1322_p13 }
  0x44   :  { %1332 = shalt.err (!%p1329_p3)
}
  0x45   :  { %49 = dma.hbm_to_vmem [thread:$0]  %s1781_s2, 128, %s47_s15, [#allocation6]  }
  0x46   :  { %s1333_s30 = scalar_lea.hbm %s1783_s4, 512 }
  0x47   :  { %p1334_p4 = scmp.ne.s32.totalorder %s1783_s4, %s1333_s30  ;;  %p1337_p5 = scmp.lt.u32.totalorder %s1333_s30, %s1783_s4 }
  0x49   :  { %p1339_p6 = pnand %p1337_p5, %p1334_p4 }
  0x4b   :  { %1342 = shalt.err (!%p1339_p6)
}
  0x4c   :  { %s1343_s12 = scalar_lea.vmem %s68_s18, 512  ;;  %p1348_p8 = scmp.lt.s32.totalorder %s68_s18, %s68_s18 }
  0x4d   :  { %p1344_p7 = scmp.ne.s32.totalorder %s68_s18, %s1343_s12  ;;  %p1349_p9 = scmp.lt.s32.totalorder %s1343_s12, %s1343_s12 }
  0x4f   :  { %p1350_p10 = por %p1349_p9, %p1348_p8 }
  0x51   :  { %p1351_p11 = pnand %p1350_p10, %p1344_p7 }
  0x53   :  { %1354 = shalt.err (!%p1351_p11)
}
  0x54   :  { %73 = dma.hbm_to_vmem [thread:$0]  %s1783_s4, 512, %s68_s18, [#allocation9], %s1412_s24, %s1412_s24, %s1413_s25  }
  0x55   :  { %1399 = dma.done.wait [#allocation3], 512  }
  0x56   :  { %1400 = vsyncadd [#allocation3], 4294966784 }
  0x57   :  { %1401 = dma.done.wait [#allocation6], 256  }
  0x58   :  { %1402 = vsyncadd [#allocation6], 4294967040 }
  0x59   :  { %1403 = dma.done.wait [#allocation9], 1024  }
  0x5a   :  { %1404 = vsyncadd [#allocation9], 4294966272  ;;  %v1416_v0 = vmov 0.0   ;;  %vm1417_vm0 = vmmov 0   ;;  %v261_v1 = vld [vmem:[#allocation5] sm:$0xff]  ;;  %s1418_s13 = smov 32   ;;  %v247_v13 = vlaneseq }
  0x5b   :  { %1061 = vmatprep.subr.bf16.mxu1 %v1416_v0  ;;  %1069 = vmatprep.mubr.msk.bf16.mxu1 %vm1417_vm0, %v1416_v0  ;;  %v1169_v2 = vld [vmem:[#allocation8] sm:$0xff]   ;;  %v1170_v3 = vld [vmem:[#allocation8 + $0x8] sm:$0xff]   ;;  %v1172_v5 = vld [vmem:[#allocation8 + $0x10] sm:$0xff]   ;;  %vm152_vm1 = vcmask 523264   ;;  %vm267_vm8 = vcmask 261120   ;;  %s1420_s15 = smov [#allocation11]  }
  0x5c   :  { %264 = vrot.lane.b32.xlu0 %v261_v1, %s1418_s13  ;;  %1045 = vmatprep.subr.bf16.mxu0 %v1169_v2  ;;  %v1534_v4 = vld [vmem:[#allocation10] sm:$0xff]   ;;  %v1537_v6 = vld [vmem:[#allocation10 + $0x8] sm:$0xff]   ;;  %v1175_v7 = vld [vmem:[#allocation2] sm:$0xff]   ;;  %v248_v14 = vshrl.u32 %v247_v13, 7  ;;  %v250_v15 = vand.u32 127, %v247_v13  ;;  %s940_s17 = sshll.u32 %s1420_s15, 4  ;;  %s941_s17 = int_to_ptr.vmem [resolvable:$true] %s940_s17 }
  0x5d   :  { %1046 = vmatpush3.bf16.msra.mxu0 %v1169_v2  ;;  %1062 = vmatpush3.bf16.msra.mxu1 %v1534_v4  ;;  %v1174_v8 = vld [vmem:[#allocation8 + $0x18] sm:$0xff]   ;;  %v1541_v9 = vld [vmem:[#allocation10 + $0x10] sm:$0xff]   ;;  %v1179_v45 = vld [vmem:[#allocation2 + $0x10] sm:$0xff]   ;;  %vm930_vm13 = vcmask 519168  }
  0x5e   :  { %1047 = vmatprep.subr.bf16.mxu0 %v1170_v3  ;;  %1063 = vmatprep.subr.bf16.mxu1 %v1416_v0  ;;  %v262_v10 = vld [vmem:[#allocation7] sm:$0xff]  ;;  %vm251_vm2 = vcmp.lt.s32.totalorder %v248_v14, 4  ;;  %vm252_vm3 = vcmp.lt.s32.totalorder %v250_v15, 32  ;;  %vm254_vm4 = vcmp.ge.s32.totalorder %v248_v14, 4  ;;  %vm255_vm5 = vcmp.ge.s32.totalorder %v250_v15, 32  ;;  %v1587_v25 = vld [vmem:[%s1784_s5] sm:$0xff] }
  0x5f   :  { %1053 = vmatprep.mubr.msk.bf16.mxu0 %vm152_vm1, %v1175_v7  ;;  %348 = vrot.lane.b32.xlu1 %v262_v10, %s1418_s13  ;;  %v1547_v11 = vld [vmem:[#allocation10 + $0x18] sm:$0xff]   ;;  %vm253_vm6 = vmand %vm251_vm2, %vm252_vm3  ;;  %vm258_vm10 = vcmp.ge.s32.totalorder %v250_v15, 64  ;;  %vm259_vm11 = vcmp.lt.s32.totalorder %v250_v15, 96  ;;  %v1180_v46 = vld [vmem:[#allocation2 + $0x18] sm:$0xff]   ;;  %s1419_s5 = smov [#allocation12]  }
  0x60   :  { %v1177_v12 = vld [vmem:[#allocation2 + $0x8] sm:$0xff]   ;;  %vm256_vm7 = vmand %vm254_vm4, %vm255_vm5  ;;  %s950_s14 = sshll.u32 %s1419_s5, 4  ;;  %s951_s14 = int_to_ptr.vmem [resolvable:$true] %s950_s14 }
  0x61   :  { %1048 = vmatpush3.bf16.msra.mxu0 %v1170_v3  ;;  %1064 = vmatpush3.bf16.msra.mxu1 %v1537_v6  ;;  %vm1562_vm9 = vmor %vm253_vm6, %vm256_vm7  ;;  %s1355_s18 = scalar_lea.vmem %s951_s14, 128  ;;  %p1360_p13 = scmp.lt.s32.totalorder %s951_s14, %s951_s14 }
  0x62   :  { %1049 = vmatprep.subr.bf16.mxu0 %v1172_v5  ;;  %1065 = vmatprep.subr.bf16.mxu1 %v1416_v0  ;;  %vm1590_vm12 = vmand %vm258_vm10, %vm259_vm11  ;;  %p1356_p12 = scmp.ne.s32.totalorder %s951_s14, %s1355_s18  ;;  %p1361_p0 = scmp.lt.s32.totalorder %s1355_s18, %s1355_s18 }
  0x64   :  { %p1362_p1 = por %p1361_p0, %p1360_p13 }
  0x65   :  { %1050 = vmatpush3.bf16.msra.mxu0 %v1172_v5  ;;  %1066 = vmatpush3.bf16.msra.mxu1 %v1541_v9 }
  0x66   :  { %1051 = vmatprep.subr.bf16.mxu0 %v1174_v8  ;;  %1067 = vmatprep.subr.bf16.mxu1 %v1416_v0  ;;  %p1363_p2 = pnand %p1362_p1, %p1356_p12 }
  0x69   :  { %1052 = vmatpush3.bf16.msra.mxu0 %v1174_v8  ;;  %1068 = vmatpush3.bf16.msra.mxu1 %v1547_v11 }
  0x6a   :  { %1073 = vmatprep.subr.bf16.mxu0 %v1416_v0  ;;  %1085 = vmatprep.subr.bf16.mxu1 %v1416_v0 }
  0x6c   :  { %1054 = vmatmul.mubr.msk.bf16.vlgmr.msra.gmra.mrb[0].mxu0 %vm152_vm1, %v1177_v12 }
  0x6d   :  { %1074 = vmatpush3.bf16.msra.mxu0 %v1534_v4  ;;  %1057 = vmatprep.mubr.msk.bf16.mxu0 %vm152_vm1, %v1179_v45 }
  0x6e   :  { %1075 = vmatprep.subr.bf16.mxu0 %v1416_v0 }
  0x71   :  { %1076 = vmatpush3.bf16.msra.mxu0 %v1537_v6 }
  0x72   :  { %1077 = vmatprep.subr.bf16.mxu0 %v1416_v0 }
  0x74   :  { %1058 = vmatmul.mubr.msk.bf16.gmra.mrb[4].mxu0 %vm152_vm1, %v1180_v46 }
  0x75   :  { %1078 = vmatpush3.bf16.msra.mxu0 %v1541_v9  ;;  %1081 = vmatprep.mubr.msk.bf16.mxu0 %vm1417_vm0, %v1416_v0 }
  0x76   :  { %1079 = vmatprep.subr.bf16.mxu0 %v1416_v0 }
  0x79   :  { %1080 = vmatpush3.bf16.msra.mxu0 %v1547_v11 }
  0x7a   :  { %1097 = vmatprep.subr.bf16.mxu0 %v1416_v0 }
  0xce   :  { %v265_v17 = vpop.permute.xlu0 %264 }
  0xcf   :  { %v268_v18 = vsel %vm267_vm8, %v261_v1, %v265_v17 }
  0xd0   :  { %v269_v19 = vsel %vm1562_vm9, %v268_v18, 0.0 }
  0xd1   :  { %v270_v20 = vpack.c.bf16 %v269_v19, %v269_v19  ;;  %v349_v41 = vpop.permute.xlu1 %348 }
  0xd3   :  { %1070 = vmatmul.mubr.msk.bf16.vlgmr.msra.gmra.mrb[0].mxu1 %vm152_vm1, %v270_v20 }
  0xd4   :  { %1086 = vmatpush3.bf16.msra.mxu1 %v1534_v4  ;;  %1093 = vmatprep.mubr.msk.bf16.mxu1 %vm1417_vm0, %v1416_v0 }
  0xd5   :  { %1087 = vmatprep.subr.bf16.mxu1 %v1416_v0 }
  0xd8   :  { %1088 = vmatpush3.bf16.msra.mxu1 %v1537_v6 }
  0xd9   :  { %1089 = vmatprep.subr.bf16.mxu1 %v1416_v0 }
  0xdc   :  { %1090 = vmatpush3.bf16.msra.mxu1 %v1541_v9 }
  0xdd   :  { %1091 = vmatprep.subr.bf16.mxu1 %v1416_v0 }
  0xe0   :  { %1092 = vmatpush3.bf16.msra.mxu1 %v1547_v11 }
  0xe1   :  { %1109 = vmatprep.subr.bf16.mxu1 %v1416_v0 }
 0x13f   :  { %v1580_v21 = vpop.f32.mrb[0].mxu0 }
 0x140   :  { %v199_v22 = vpop.f32.mrb[1].mxu0 }
 0x141   :  { %v1582_v23 = vpop.f32.mrb[2].mxu0  ;;  %v231_v26 = vadd.f32 %v1587_v25, %v199_v22 }
 0x142   :  { %v202_v24 = vpop.f32.mrb[3].mxu0 }
 0x143   :  { %v232_v59 = vadd.f32 %v1587_v25, %v202_v24 }
 0x147   :  { %v1605_v50 = vpop.f32.mrb[4].mxu0 }
 0x148   :  { %v1607_v51 = vpop.f32.mrb[5].mxu0 }
 0x149   :  { %v1609_v52 = vpop.f32.mrb[6].mxu0 }
 0x14a   :  { %v1611_v53 = vpop.f32.mrb[7].mxu0 }
 0x1a6   :  { %v332_v27 = vpop.f32.mrb[0].mxu1 }
 0x1a7   :  { %v338_v28 = vadd.f32 %v332_v27, %v231_v26  ;;  %v1071_v29 = vpop.f32.mrb[1].mxu1 }
 0x1a8   :  { %v335_v30 = vpop.f32.mrb[2].mxu1  ;;  %v233_v29 = vadd.f32 %v1580_v21, %v1587_v25 }
 0x1a9   :  { %v982_v31 = vmul.f32 -1.442695, %v338_v28  ;;  %v1072_v32 = vpop.f32.mrb[3].mxu1 }
 0x1ab   :  { %1181 = vpow2.f32 %v982_v31 }
 0x1ac   :  { %1183 = vtanh.f32 %v338_v28 }
 0x1b5   :  { %v1182_v33 = vpop.eup %1181 }
 0x1b6   :  { %v343_v34 = vadd.f32 1.0, %v1182_v33  ;;  %v1184_v36 = vpop.eup %1183 }
 0x1b8   :  { %1185 = vrcp.f32 %v343_v34 }
 0x1c2   :  { %v1186_v37 = vpop.eup %1185 }
 0x1c3   :  { %v346_v38 = vsel %vm1590_vm12, %v1184_v36, %v1186_v37 }
 0x1c4   :  { %353 = vrot.lane.b32.xlu0 %v346_v38, %s1412_s24  ;;  %v351_v42 = vmul.f32 %v349_v41, %v346_v38 }
 0x236   :  { %v354_v39 = vpop.permute.xlu0 %353 }
 0x237   :  { %v356_v40 = vmul.f32 %v354_v39, %v346_v38 }
 0x239   :  { %358 = vrot.lane.b32.xlu1 %v356_v40, %s1418_s13 }
 0x2ab   :  { %v359_v43 = vpop.permute.xlu1 %358 }
 0x2ac   :  { %v361_v44 = vadd.f32 %v359_v43, %v351_v42 }
 0x2ae   :  { %1187 = vtanh.f32 %v361_v44 }
 0x2b8   :  { %v1188_v47 = vpop.eup %1187 }
 0x2b9   :  { %364 = vrot.lane.b32.xlu0 %v1188_v47, %s1412_s24 }
 0x32b   :  { %v365_v48 = vpop.permute.xlu0 %364 }
 0x32c   :  { %v367_v49 = vmul.f32 %v365_v48, %v346_v38 }
 0x32e   :  { %372 = vrot.lane.b32.xlu0 %v367_v49, %s1412_s24  ;;  %369 = vrot.lane.b32.xlu1 %v367_v49, %s1418_s13 }
 0x3a0   :  { %v373_v54 = vpop.permute.xlu0 %372  ;;  %v370_v55 = vpop.permute.xlu1 %369 }
 0x3a1   :  { %v375_v56 = vsel %vm267_vm8, %v370_v55, %v373_v54 }
 0x3a2   :  { %v376_v57 = vsel %vm1562_vm9, %v375_v56, 0.0 }
 0x3a3   :  { %v377_v58 = vpack.c.bf16 %v376_v57, %v376_v57 }
 0x3a5   :  { %1082 = vmatmul.mubr.msk.bf16.vlgmr.msra.gmra.mrb[8].mxu0 %vm152_vm1, %v377_v58  ;;  %v234_v58 = vadd.f32 %v1582_v23, %v1587_v25 }
 0x3a6   :  { %1098 = vmatpush3.bf16.msra.mxu0 %v1534_v4  ;;  %1105 = vmatprep.mubr.msk.bf16.mxu0 %vm1417_vm0, %v1416_v0 }
 0x3a7   :  { %1099 = vmatprep.subr.bf16.mxu0 %v1416_v0 }
 0x3aa   :  { %1100 = vmatpush3.bf16.msra.mxu0 %v1537_v6 }
 0x3ab   :  { %1101 = vmatprep.subr.bf16.mxu0 %v1416_v0 }
 0x3ae   :  { %1102 = vmatpush3.bf16.msra.mxu0 %v1541_v9 }
 0x3af   :  { %1103 = vmatprep.subr.bf16.mxu0 %v1416_v0 }
 0x3b2   :  { %1104 = vmatpush3.bf16.msra.mxu0 %v1547_v11 }
 0x3b3   :  { %1121 = vmatprep.subr.bf16.mxu0 %v1416_v0 }
 0x478   :  { %v415_v60 = vpop.f32.mrb[8].mxu0 }
 0x479   :  { %v421_v61 = vadd.f32 %v415_v60, %v232_v59  ;;  %v1083_v62 = vpop.f32.mrb[9].mxu0 }
 0x47a   :  { %v418_v63 = vpop.f32.mrb[10].mxu0 }
 0x47b   :  { %v984_v1 = vmul.f32 -1.442695, %v421_v61  ;;  %v1084_v2 = vpop.f32.mrb[11].mxu0 }
 0x47d   :  { %1189 = vpow2.f32 %v984_v1 }
 0x47e   :  { %1191 = vtanh.f32 %v421_v61 }
 0x487   :  { %v1190_v3 = vpop.eup %1189 }
 0x488   :  { %v426_v5 = vadd.f32 1.0, %v1190_v3  ;;  %v1192_v7 = vpop.eup %1191 }
 0x48a   :  { %1193 = vrcp.f32 %v426_v5 }
 0x494   :  { %v1194_v8 = vpop.eup %1193 }
 0x495   :  { %v429_v10 = vsel %vm1590_vm12, %v1192_v7, %v1194_v8 }
 0x496   :  { %432 = vrot.lane.b32.xlu1 %v429_v10, %s1412_s24  ;;  %v430_v14 = vmul.f32 %v429_v10, %v361_v44 }
 0x508   :  { %v433_v12 = vpop.permute.xlu1 %432 }
 0x509   :  { %v435_v13 = vmul.f32 %v433_v12, %v429_v10 }
 0x50b   :  { %437 = vrot.lane.b32.xlu0 %v435_v13, %s1418_s13 }
 0x57d   :  { %v438_v15 = vpop.permute.xlu0 %437 }
 0x57e   :  { %v440_v17 = vadd.f32 %v438_v15, %v430_v14 }
 0x580   :  { %1195 = vtanh.f32 %v440_v17 }
 0x58a   :  { %v1196_v18 = vpop.eup %1195 }
 0x58b   :  { %443 = vrot.lane.b32.xlu1 %v1196_v18, %s1412_s24 }
 0x5fd   :  { %v444_v19 = vpop.permute.xlu1 %443 }
 0x5fe   :  { %v446_v20 = vmul.f32 %v444_v19, %v429_v10 }
 0x600   :  { %451 = vrot.lane.b32.xlu1 %v446_v20, %s1412_s24  ;;  %448 = vrot.lane.b32.xlu0 %v446_v20, %s1418_s13 }
 0x672   :  { %v452_v22 = vpop.permute.xlu1 %451  ;;  %v449_v24 = vpop.permute.xlu0 %448 }
 0x673   :  { %v454_v26 = vsel %vm267_vm8, %v449_v24, %v452_v22 }
 0x674   :  { %v455_v27 = vsel %vm1562_vm9, %v454_v26, 0.0 }
 0x675   :  { %v456_v28 = vpack.c.bf16 %v455_v27, %v455_v27  ;;  %v235_v27 = vadd.f32 %v1587_v25, %v1607_v51 }
 0x677   :  { %1094 = vmatmul.mubr.msk.bf16.vlgmr.msra.gmra.mrb[4].mxu1 %vm152_vm1, %v456_v28 }
 0x678   :  { %1110 = vmatpush3.bf16.msra.mxu1 %v1534_v4  ;;  %1117 = vmatprep.mubr.msk.bf16.mxu1 %vm1417_vm0, %v1416_v0 }
 0x679   :  { %1111 = vmatprep.subr.bf16.mxu1 %v1416_v0 }
 0x67c   :  { %1112 = vmatpush3.bf16.msra.mxu1 %v1537_v6 }
 0x67d   :  { %1113 = vmatprep.subr.bf16.mxu1 %v1416_v0 }
 0x680   :  { %1114 = vmatpush3.bf16.msra.mxu1 %v1541_v9 }
 0x681   :  { %1115 = vmatprep.subr.bf16.mxu1 %v1416_v0 }
 0x684   :  { %1116 = vmatpush3.bf16.msra.mxu1 %v1547_v11 }
 0x685   :  { %1133 = vmatprep.subr.bf16.mxu1 %v1416_v0 }
 0x74a   :  { %v494_v30 = vpop.f32.mrb[4].mxu1 }
 0x74b   :  { %v500_v31 = vadd.f32 %v494_v30, %v233_v29  ;;  %v1095_v32 = vpop.f32.mrb[5].mxu1 }
 0x74c   :  { %v497_v33 = vpop.f32.mrb[6].mxu1 }
 0x74d   :  { %v986_v34 = vmul.f32 -1.442695, %v500_v31  ;;  %v1096_v36 = vpop.f32.mrb[7].mxu1 }
 0x74f   :  { %1197 = vpow2.f32 %v986_v34 }
 0x750   :  { %1199 = vtanh.f32 %v500_v31 }
 0x759   :  { %v1198_v37 = vpop.eup %1197 }
 0x75a   :  { %v505_v38 = vadd.f32 1.0, %v1198_v37  ;;  %v1200_v39 = vpop.eup %1199 }
 0x75c   :  { %1201 = vrcp.f32 %v505_v38 }
 0x766   :  { %v1202_v40 = vpop.eup %1201 }
 0x767   :  { %v508_v41 = vsel %vm1590_vm12, %v1200_v39, %v1202_v40 }
 0x768   :  { %511 = vrot.lane.b32.xlu0 %v508_v41, %s1412_s24  ;;  %v509_v43 = vmul.f32 %v508_v41, %v440_v17 }
 0x7da   :  { %v512_v42 = vpop.permute.xlu0 %511 }
 0x7db   :  { %v514_v21 = vmul.f32 %v512_v42, %v508_v41 }
 0x7dd   :  { %516 = vrot.lane.b32.xlu1 %v514_v21, %s1418_s13 }
 0x84f   :  { %v517_v44 = vpop.permute.xlu1 %516 }
 0x850   :  { %v519_v45 = vadd.f32 %v517_v44, %v509_v43 }
 0x852   :  { %1203 = vtanh.f32 %v519_v45 }
 0x85c   :  { %v1204_v46 = vpop.eup %1203 }
 0x85d   :  { %522 = vrot.lane.b32.xlu0 %v1204_v46, %s1412_s24 }
 0x8cf   :  { %v523_v47 = vpop.permute.xlu0 %522 }
 0x8d0   :  { %v525_v48 = vmul.f32 %v523_v47, %v508_v41 }
 0x8d2   :  { %530 = vrot.lane.b32.xlu0 %v525_v48, %s1412_s24  ;;  %527 = vrot.lane.b32.xlu1 %v525_v48, %s1418_s13 }
 0x944   :  { %v531_v49 = vpop.permute.xlu0 %530  ;;  %v528_v54 = vpop.permute.xlu1 %527 }
 0x945   :  { %v533_v55 = vsel %vm267_vm8, %v528_v54, %v531_v49 }
 0x946   :  { %v534_v56 = vsel %vm1562_vm9, %v533_v55, 0.0  ;;  %v236_v55 = vadd.f32 %v1587_v25, %v1611_v53 }
 0x947   :  { %v535_v57 = vpack.c.bf16 %v534_v56, %v534_v56 }
 0x949   :  { %1106 = vmatmul.mubr.msk.bf16.vlgmr.msra.gmra.mrb[12].mxu0 %vm152_vm1, %v535_v57 }
 0x94a   :  { %1122 = vmatpush3.bf16.msra.mxu0 %v1534_v4  ;;  %1129 = vmatprep.mubr.msk.bf16.mxu0 %vm1417_vm0, %v1416_v0 }
 0x94b   :  { %1123 = vmatprep.subr.bf16.mxu0 %v1416_v0 }
 0x94e   :  { %1124 = vmatpush3.bf16.msra.mxu0 %v1537_v6 }
 0x94f   :  { %1125 = vmatprep.subr.bf16.mxu0 %v1416_v0 }
 0x952   :  { %1126 = vmatpush3.bf16.msra.mxu0 %v1541_v9 }
 0x953   :  { %1127 = vmatprep.subr.bf16.mxu0 %v1416_v0 }
 0x956   :  { %1128 = vmatpush3.bf16.msra.mxu0 %v1547_v11 }
 0x957   :  { %1145 = vmatprep.subr.bf16.mxu0 %v1416_v0 }
 0xa1c   :  { %v573_v59 = vpop.f32.mrb[12].mxu0 }
 0xa1d   :  { %v579_v60 = vadd.f32 %v573_v59, %v234_v58  ;;  %v1107_v61 = vpop.f32.mrb[13].mxu0 }
 0xa1e   :  { %v576_v62 = vpop.f32.mrb[14].mxu0 }
 0xa1f   :  { %v988_v63 = vmul.f32 -1.442695, %v579_v60  ;;  %v1108_v1 = vpop.f32.mrb[15].mxu0 }
 0xa21   :  { %1205 = vpow2.f32 %v988_v63 }
 0xa22   :  { %1207 = vtanh.f32 %v579_v60 }
 0xa2b   :  { %v1206_v2 = vpop.eup %1205 }
 0xa2c   :  { %v584_v3 = vadd.f32 1.0, %v1206_v2  ;;  %v1208_v5 = vpop.eup %1207 }
 0xa2e   :  { %1209 = vrcp.f32 %v584_v3 }
 0xa38   :  { %v1210_v7 = vpop.eup %1209 }
 0xa39   :  { %v587_v8 = vsel %vm1590_vm12, %v1208_v5, %v1210_v7 }
 0xa3a   :  { %590 = vrot.lane.b32.xlu1 %v587_v8, %s1412_s24  ;;  %v588_v12 = vmul.f32 %v587_v8, %v519_v45 }
 0xaac   :  { %v591_v10 = vpop.permute.xlu1 %590 }
 0xaad   :  { %v593_v23 = vmul.f32 %v591_v10, %v587_v8 }
 0xaaf   :  { %595 = vrot.lane.b32.xlu0 %v593_v23, %s1418_s13 }
 0xb21   :  { %v596_v13 = vpop.permute.xlu0 %595 }
 0xb22   :  { %v598_v14 = vadd.f32 %v596_v13, %v588_v12 }
 0xb24   :  { %1211 = vtanh.f32 %v598_v14 }
 0xb2e   :  { %v1212_v15 = vpop.eup %1211 }
 0xb2f   :  { %601 = vrot.lane.b32.xlu1 %v1212_v15, %s1412_s24 }
 0xba1   :  { %v602_v17 = vpop.permute.xlu1 %601 }
 0xba2   :  { %v604_v18 = vmul.f32 %v602_v17, %v587_v8 }
 0xba4   :  { %609 = vrot.lane.b32.xlu1 %v604_v18, %s1412_s24  ;;  %606 = vrot.lane.b32.xlu0 %v604_v18, %s1418_s13 }
 0xc16   :  { %v610_v19 = vpop.permute.xlu1 %609  ;;  %v607_v20 = vpop.permute.xlu0 %606 }
 0xc17   :  { %v612_v22 = vsel %vm267_vm8, %v607_v20, %v610_v19 }
 0xc18   :  { %v613_v24 = vsel %vm1562_vm9, %v612_v22, 0.0 }
 0xc19   :  { %v614_v26 = vpack.c.bf16 %v613_v24, %v613_v24 }
 0xc1b   :  { %1118 = vmatmul.mubr.msk.bf16.vlgmr.msra.gmra.mrb[8].mxu1 %vm152_vm1, %v614_v26 }
 0xc1c   :  { %1134 = vmatpush3.bf16.msra.mxu1 %v1534_v4  ;;  %1141 = vmatprep.mubr.msk.bf16.mxu1 %vm1417_vm0, %v1416_v0 }
 0xc1d   :  { %1135 = vmatprep.subr.bf16.mxu1 %v1416_v0 }
 0xc20   :  { %1136 = vmatpush3.bf16.msra.mxu1 %v1537_v6 }
 0xc21   :  { %1137 = vmatprep.subr.bf16.mxu1 %v1416_v0 }
 0xc24   :  { %1138 = vmatpush3.bf16.msra.mxu1 %v1541_v9 }
 0xc25   :  { %1139 = vmatprep.subr.bf16.mxu1 %v1416_v0 }
 0xc28   :  { %1140 = vmatpush3.bf16.msra.mxu1 %v1547_v11 }
 0xcee   :  { %v652_v28 = vpop.f32.mrb[8].mxu1 }
 0xcef   :  { %v658_v29 = vadd.f32 %v652_v28, %v235_v27  ;;  %v1119_v30 = vpop.f32.mrb[9].mxu1 }
 0xcf0   :  { %v655_v31 = vpop.f32.mrb[10].mxu1 }
 0xcf1   :  { %v990_v32 = vmul.f32 -1.442695, %v658_v29  ;;  %v1120_v33 = vpop.f32.mrb[11].mxu1 }
 0xcf3   :  { %1213 = vpow2.f32 %v990_v32 }
 0xcf4   :  { %1215 = vtanh.f32 %v658_v29 }
 0xcfd   :  { %v1214_v34 = vpop.eup %1213 }
 0xcfe   :  { %v663_v36 = vadd.f32 1.0, %v1214_v34  ;;  %v1216_v37 = vpop.eup %1215 }
 0xd00   :  { %1217 = vrcp.f32 %v663_v36 }
 0xd0a   :  { %v1218_v38 = vpop.eup %1217 }
 0xd0b   :  { %v666_v39 = vsel %vm1590_vm12, %v1216_v37, %v1218_v38 }
 0xd0c   :  { %669 = vrot.lane.b32.xlu0 %v666_v39, %s1412_s24  ;;  %v667_v41 = vmul.f32 %v666_v39, %v598_v14  ;;  %v237_v14 = vadd.f32 %v1605_v50, %v1587_v25 }
 0xd7e   :  { %v670_v40 = vpop.permute.xlu0 %669 }
 0xd7f   :  { %v672_v51 = vmul.f32 %v670_v40, %v666_v39 }
 0xd81   :  { %674 = vrot.lane.b32.xlu1 %v672_v51, %s1418_s13 }
 0xdf3   :  { %v675_v42 = vpop.permute.xlu1 %674 }
 0xdf4   :  { %v677_v21 = vadd.f32 %v675_v42, %v667_v41  ;;  %v238_v42 = vadd.f32 %v1609_v52, %v1587_v25 }
 0xdf6   :  { %1219 = vtanh.f32 %v677_v21 }
 0xe00   :  { %v1220_v43 = vpop.eup %1219 }
 0xe01   :  { %680 = vrot.lane.b32.xlu0 %v1220_v43, %s1412_s24 }
 0xe73   :  { %v681_v44 = vpop.permute.xlu0 %680 }
 0xe74   :  { %v683_v45 = vmul.f32 %v681_v44, %v666_v39 }
 0xe76   :  { %688 = vrot.lane.b32.xlu0 %v683_v45, %s1412_s24  ;;  %685 = vrot.lane.b32.xlu1 %v683_v45, %s1418_s13 }
 0xee8   :  { %v689_v46 = vpop.permute.xlu0 %688  ;;  %v686_v47 = vpop.permute.xlu1 %685 }
 0xee9   :  { %v691_v48 = vsel %vm267_vm8, %v686_v47, %v689_v46 }
 0xeea   :  { %v692_v49 = vsel %vm1562_vm9, %v691_v48, 0.0 }
 0xeeb   :  { %v693_v54 = vpack.c.bf16 %v692_v49, %v692_v49 }
 0xeed   :  { %1130 = vmatmul.mubr.msk.bf16.vlgmr.msra.gmra.mrb[16].mxu0 %vm152_vm1, %v693_v54 }
 0xeee   :  { %1146 = vmatpush3.bf16.msra.mxu0 %v1534_v4  ;;  %1153 = vmatprep.mubr.msk.bf16.mxu0 %vm1417_vm0, %v1416_v0 }
 0xeef   :  { %1147 = vmatprep.subr.bf16.mxu0 %v1416_v0 }
 0xef2   :  { %1148 = vmatpush3.bf16.msra.mxu0 %v1537_v6 }
 0xef3   :  { %1149 = vmatprep.subr.bf16.mxu0 %v1416_v0 }
 0xef6   :  { %1150 = vmatpush3.bf16.msra.mxu0 %v1541_v9 }
 0xef7   :  { %1151 = vmatprep.subr.bf16.mxu0 %v1416_v0 }
 0xefa   :  { %1152 = vmatpush3.bf16.msra.mxu0 %v1547_v11 }
 0xfc0   :  { %v731_v56 = vpop.f32.mrb[16].mxu0 }
 0xfc1   :  { %v737_v4 = vadd.f32 %v731_v56, %v236_v55  ;;  %v1131_v57 = vpop.f32.mrb[17].mxu0 }
 0xfc2   :  { %v734_v58 = vpop.f32.mrb[18].mxu0 }
 0xfc3   :  { %v992_v59 = vmul.f32 -1.442695, %v737_v4  ;;  %v1132_v60 = vpop.f32.mrb[19].mxu0 }
 0xfc5   :  { %1221 = vpow2.f32 %v992_v59 }
 0xfc6   :  { %1223 = vtanh.f32 %v737_v4 }
 0xfcf   :  { %v1222_v61 = vpop.eup %1221 }
 0xfd0   :  { %v742_v6 = vadd.f32 1.0, %v1222_v61  ;;  %v1224_v62 = vpop.eup %1223 }
 0xfd2   :  { %1225 = vrcp.f32 %v742_v6 }
 0xfdc   :  { %v1226_v9 = vpop.eup %1225 }
 0xfdd   :  { %v745_v0 = vsel %vm1590_vm12, %v1224_v62, %v1226_v9 }
 0xfde   :  { %748 = vrot.lane.b32.xlu1 %v745_v0, %s1412_s24  ;;  %v746_v63 = vmul.f32 %v745_v0, %v677_v21 }
0x1050   :  { %v749_v11 = vpop.permute.xlu1 %748 }
0x1051   :  { %v751_v53 = vmul.f32 %v749_v11, %v745_v0 }
0x1053   :  { %753 = vrot.lane.b32.xlu0 %v751_v53, %s1418_s13 }
0x10c5   :  { %v754_v1 = vpop.permute.xlu0 %753 }
0x10c6   :  { %v756_v2 = vadd.f32 %v754_v1, %v746_v63 }
0x10c8   :  { %1227 = vtanh.f32 %v756_v2 }
0x10d2   :  { %v1228_v3 = vpop.eup %1227 }
0x10d3   :  { %759 = vrot.lane.b32.xlu1 %v1228_v3, %s1412_s24 }
0x1145   :  { %v760_v5 = vpop.permute.xlu1 %759 }
0x1146   :  { %v762_v7 = vmul.f32 %v760_v5, %v745_v0 }
0x1148   :  { %767 = vrot.lane.b32.xlu1 %v762_v7, %s1412_s24  ;;  %764 = vrot.lane.b32.xlu0 %v762_v7, %s1418_s13 }
0x11ba   :  { %v768_v8 = vpop.permute.xlu1 %767  ;;  %v765_v10 = vpop.permute.xlu0 %764 }
0x11bb   :  { %v770_v23 = vsel %vm267_vm8, %v765_v10, %v768_v8 }
0x11bc   :  { %v771_v12 = vsel %vm1562_vm9, %v770_v23, 0.0 }
0x11bd   :  { %v772_v13 = vpack.c.bf16 %v771_v12, %v771_v12 }
0x11bf   :  { %1142 = vmatmul.mubr.msk.bf16.vlgmr.msra.gmra.mrb[12].mxu1 %vm152_vm1, %v772_v13 }
0x1292   :  { %v810_v15 = vpop.f32.mrb[12].mxu1 }
0x1293   :  { %v816_v17 = vadd.f32 %v810_v15, %v237_v14  ;;  %v1143_v18 = vpop.f32.mrb[13].mxu1 }
0x1294   :  { %v813_v19 = vpop.f32.mrb[14].mxu1 }
0x1295   :  { %v994_v20 = vmul.f32 -1.442695, %v816_v17  ;;  %v1144_v22 = vpop.f32.mrb[15].mxu1 }
0x1297   :  { %1229 = vpow2.f32 %v994_v20 }
0x1298   :  { %1231 = vtanh.f32 %v816_v17 }
0x12a1   :  { %v1230_v24 = vpop.eup %1229 }
0x12a2   :  { %v821_v26 = vadd.f32 1.0, %v1230_v24  ;;  %v1232_v27 = vpop.eup %1231 }
0x12a4   :  { %1233 = vrcp.f32 %v821_v26 }
0x12ae   :  { %v1234_v28 = vpop.eup %1233 }
0x12af   :  { %v824_v29 = vsel %vm1590_vm12, %v1232_v27, %v1234_v28 }
0x12b0   :  { %827 = vrot.lane.b32.xlu0 %v824_v29, %s1412_s24  ;;  %v825_v31 = vmul.f32 %v824_v29, %v756_v2 }
0x1322   :  { %v828_v30 = vpop.permute.xlu0 %827 }
0x1323   :  { %v830_v50 = vmul.f32 %v828_v30, %v824_v29 }
0x1325   :  { %832 = vrot.lane.b32.xlu1 %v830_v50, %s1418_s13 }
0x1397   :  { %v833_v32 = vpop.permute.xlu1 %832 }
0x1398   :  { %v835_v33 = vadd.f32 %v833_v32, %v825_v31 }
0x139a   :  { %1235 = vtanh.f32 %v835_v33 }
0x13a4   :  { %v1236_v34 = vpop.eup %1235 }
0x13a5   :  { %838 = vrot.lane.b32.xlu0 %v1236_v34, %s1412_s24 }
0x1417   :  { %v839_v36 = vpop.permute.xlu0 %838 }
0x1418   :  { %v841_v37 = vmul.f32 %v839_v36, %v824_v29 }
0x141a   :  { %846 = vrot.lane.b32.xlu0 %v841_v37, %s1412_s24  ;;  %843 = vrot.lane.b32.xlu1 %v841_v37, %s1418_s13 }
0x148c   :  { %v847_v38 = vpop.permute.xlu0 %846  ;;  %v844_v39 = vpop.permute.xlu1 %843 }
0x148d   :  { %v849_v40 = vsel %vm267_vm8, %v844_v39, %v847_v38 }
0x148e   :  { %v850_v51 = vsel %vm1562_vm9, %v849_v40, 0.0 }
0x148f   :  { %v851_v41 = vpack.c.bf16 %v850_v51, %v850_v51 }
0x1491   :  { %1154 = vmatmul.mubr.msk.bf16.vlgmr.msra.gmra.mrb[20].mxu0 %vm152_vm1, %v851_v41 }
0x1564   :  { %v889_v21 = vpop.f32.mrb[20].mxu0 }
0x1565   :  { %v895_v43 = vadd.f32 %v889_v21, %v238_v42  ;;  %v1155_v44 = vpop.f32.mrb[21].mxu0 }
0x1566   :  { %v892_v45 = vpop.f32.mrb[22].mxu0 }
0x1567   :  { %v996_v46 = vmul.f32 -1.442695, %v895_v43  ;;  %v1156_v47 = vpop.f32.mrb[23].mxu0 }
0x1569   :  { %1237 = vpow2.f32 %v996_v46 }
0x156a   :  { %1239 = vtanh.f32 %v895_v43 }
0x1573   :  { %v1238_v48 = vpop.eup %1237 }
0x1574   :  { %v900_v49 = vadd.f32 1.0, %v1238_v48  ;;  %v1240_v54 = vpop.eup %1239 }
0x1576   :  { %1241 = vrcp.f32 %v900_v49 }
0x1580   :  { %v1242_v16 = vpop.eup %1241 }
0x1581   :  { %v903_v55 = vsel %vm1590_vm12, %v1240_v54, %v1242_v16 }
0x1582   :  { %906 = vrot.lane.b32.xlu1 %v903_v55, %s1412_s24  ;;  %v904_v52 = vmul.f32 %v903_v55, %v835_v33 }
0x15f4   :  { %v907_v56 = vpop.permute.xlu1 %906 }
0x15f5   :  { %v909_v25 = vmul.f32 %v907_v56, %v903_v55 }
0x15f7   :  { %911 = vrot.lane.b32.xlu0 %v909_v25, %s1418_s13 }
0x1669   :  { %v912_v4 = vpop.permute.xlu0 %911 }
0x166a   :  { %v914_v57 = vadd.f32 %v912_v4, %v904_v52 }
0x166c   :  { %1243 = vtanh.f32 %v914_v57 }
0x1676   :  { %v1244_v58 = vpop.eup %1243 }
0x1677   :  { %917 = vrot.lane.b32.xlu1 %v1244_v58, %s1412_s24 }
0x16e9   :  { %v918_v59 = vpop.permute.xlu1 %917 }
0x16ea   :  { %v920_v60 = vmul.f32 %v918_v59, %v903_v55 }
0x16ec   :  { %922 = vrot.lane.b32.xlu0 %v920_v60, %s1418_s13  ;;  %v925_v61 = vrot.slane %v920_v60, 4 }
0x16ee   :  { %926 = vrot.lane.b32.xlu1 %v925_v61, %s1412_s24 }
0x175e   :  { %v923_v35 = vpop.permute.xlu0 %922 }
0x175f   :  { %v932_v6 = vsel %vm267_vm8, %v923_v35, %v914_v57 }
0x1760   :  { %933 = vst.msk [vmem:[#allocation12] sm:$0xff] %vm152_vm1, %v932_v6  ;;  %v927_v62 = vpop.permute.xlu1 %926 }
0x1761   :  { %v929_v9 = vsel %vm267_vm8, %v923_v35, %v927_v62 }
0x1762   :  { %1366 = shalt.err (!%p1363_p2)
}
0x1763   :  { %s1367_s20 = scalar_lea.hbm %s1786_s7, 128 }
0x1764   :  { %p1368_p3 = scmp.ne.s32.totalorder %s1786_s7, %s1367_s20  ;;  %p1371_p4 = scmp.lt.u32.totalorder %s1367_s20, %s1786_s7 }
0x1766   :  { %p1373_p5 = pnand %p1371_p4, %p1368_p3 }
0x1768   :  { %1376 = shalt.err (!%p1373_p5)
}
0x1769   :  { %953 = dma.vmem_to_hbm [thread:$0]  %s951_s14, 128, %s1786_s7, [#allocation13]   ;;  %931 = vst.msk [vmem:[#allocation11] sm:$0xf] %vm930_vm13, %v929_v9 }
0x176a   :  { %s1377_s16 = scalar_lea.vmem %s941_s17, 64  ;;  %p1382_p7 = scmp.lt.s32.totalorder %s941_s17, %s941_s17 }
0x176b   :  { %p1378_p6 = scmp.ne.s32.totalorder %s941_s17, %s1377_s16  ;;  %p1383_p8 = scmp.lt.s32.totalorder %s1377_s16, %s1377_s16 }
0x176d   :  { %p1384_p9 = por %p1383_p8, %p1382_p7 }
0x176f   :  { %p1385_p10 = pnand %p1384_p9, %p1378_p6 }
0x1771   :  { %1388 = shalt.err (!%p1385_p10)
}
0x1772   :  { %s1389_s29 = scalar_lea.hbm %s1785_s6, 64 }
0x1773   :  { %p1390_p11 = scmp.ne.s32.totalorder %s1785_s6, %s1389_s29  ;;  %p1393_p12 = scmp.lt.u32.totalorder %s1389_s29, %s1785_s6 }
0x1775   :  { %p1395_p13 = pnand %p1393_p12, %p1390_p11 }
0x1777   :  { %1398 = shalt.err (!%p1395_p13)
}
0x1778   :  { %943 = dma.vmem_to_hbm [thread:$0]  %s941_s17, 64, %s1785_s6, [#allocation4]  }
0x1779   :  { %1405 = dma.done.wait [#allocation4], 64  }
0x177a   :  { %1406 = vsyncadd [#allocation4], 4294967232 }
0x177b   :  { %1407 = dma.done.wait [#allocation13], 128  }
0x177c   :  { %1408 = vsyncadd [#allocation13], 4294967168 }
0x177d   :  { %960 = vsyncpa [#allocation3], 1 }
0x177e   :  { %961 = vsyncpa [#allocation6], 1 }
0x177f   :  { %962 = vsyncpa [#allocation9], 1 }
0x1780   :  { %963 = vsyncpa [#allocation4], 1 }
0x1781   :  { %964 = vsyncpa [#allocation13], 1 }

</bundles_post_ra>
